<compile_context>
chip_gen: v6e
topology: v6e:2x2x1
jax: 0.10.0
libtpu: 0.0.40
codegen_flags: <defaults>
</compile_context>

<pallas_src>
import functools

import jax
import jax.numpy as jnp
from jax.experimental import pallas as pl
from jax.experimental.pallas import tpu as pltpu

HIDDEN_PAD = 128   # hidden dim (32) zero-padded to one full lane width
HEAD_PAD = 128     # fused mean|log_std head packed into a single 128-lane slab
LOGSTD_OFF = 64    # log_std occupies lanes [64, 64 + action_dim)


def _round_up(x, m):
    return ((x + m - 1) // m) * m


# ---------------------------------------------------------------------------
# Pallas kernel: 3 bf16 matmuls (heads fused, 128-lane output) + f32 tanh/bias,
# lane-masked clamp on the log_std half.  Everything stays in VMEM.
# ---------------------------------------------------------------------------
def actor_kernel(x_ref, w1_ref, b1_ref, w2_ref, b2_ref, wh_ref, bh_ref,
                 out_ref, *, logstd_off):
    # bf16 MXU inputs, f32 accumulation; bias / tanh / clamp in f32.
    x = x_ref[...].astype(jnp.bfloat16)

    h1 = jnp.tanh(
        jnp.dot(x, w1_ref[...], preferred_element_type=jnp.float32)
        + b1_ref[...])
    h2 = jnp.tanh(
        jnp.dot(h1.astype(jnp.bfloat16), w2_ref[...],
                preferred_element_type=jnp.float32)
        + b2_ref[...])

    # Fused heads in one 128-lane slab:
    #   lanes [0, logstd_off)      -> mean     (passthrough)
    #   lanes [logstd_off, ... )   -> log_std  (clamped to [-1.2, 2.0])
    head = (jnp.dot(h2.astype(jnp.bfloat16), wh_ref[...],
                    preferred_element_type=jnp.float32)
            + bh_ref[...])

    # 64 is an intra-vreg lane boundary, so the lane-iota select is the cheap
    # path (stores remain full-width, unmasked).
    col = jax.lax.broadcasted_iota(jnp.int32, head.shape, 1)
    out_ref[...] = jnp.where(col >= logstd_off,
                             jnp.clip(head, -1.2, 2.0),
                             head).astype(out_ref.dtype)


# ---------------------------------------------------------------------------
# Weight packing: logical (in, out) params -> lane-dense padded/fused bf16 slabs.
# Zero-padded hidden lanes stay exactly 0 through tanh, so numerics are exact
# w.r.t. the unpadded bf16 computation.
# ---------------------------------------------------------------------------
def pack_actor_params(p):
    state_dim, hidden = p["w1"].shape
    action_dim = p["wm"].shape[1]
    assert action_dim <= LOGSTD_OFF and LOGSTD_OFF + action_dim <= HEAD_PAD

    w1 = jnp.zeros((state_dim, HIDDEN_PAD), jnp.float32).at[:, :hidden].set(p["w1"])
    b1 = jnp.zeros((1, HIDDEN_PAD), jnp.float32).at[:, :hidden].set(p["b1"])
    w2 = (jnp.zeros((HIDDEN_PAD, HIDDEN_PAD), jnp.float32)
          .at[:hidden, :hidden].set(p["w2"]))
    b2 = jnp.zeros((1, HIDDEN_PAD), jnp.float32).at[:, :hidden].set(p["b2"])

    wh = (jnp.zeros((HIDDEN_PAD, HEAD_PAD), jnp.float32)
          .at[:hidden, :action_dim].set(p["wm"])
          .at[:hidden, LOGSTD_OFF:LOGSTD_OFF + action_dim].set(p["ws"]))
    bh = (jnp.zeros((1, HEAD_PAD), jnp.float32)
          .at[:, :action_dim].set(p["bm"])
          .at[:, LOGSTD_OFF:LOGSTD_OFF + action_dim].set(p["bs"]))

    return {"w1": w1.astype(jnp.bfloat16), "b1": b1,
            "w2": w2.astype(jnp.bfloat16), "b2": b2,
            "wh": wh.astype(jnp.bfloat16), "bh": bh,
            "state_dim": state_dim, "action_dim": action_dim}


# ---------------------------------------------------------------------------
# Wrapper: batch-tiled grid (>= 2 tiles), resident weights, 128-lane output.
# ---------------------------------------------------------------------------
def actor_forward(state, packed, *, block_b=4096):
    B, state_dim = state.shape
    action_dim = packed["action_dim"]

    # Tile derivation: always >= 2 tiles so the "parallel" batch axis can span
    # both TensorCores on v7x (one extra ~0.35us step on 1-TC chips, harmless);
    # otherwise aim for ~block_b rows/tile to amortize per-step overhead.
    num_tiles = max(2, pl.cdiv(B, block_b))
    tb = _round_up(pl.cdiv(B, num_tiles), 8)
    bp = num_tiles * tb
    if bp != B:
        state_p = jnp.zeros((bp, state_dim), state.dtype).at[:B].set(state)
    else:
        state_p = state

    out = pl.pallas_call(
        functools.partial(actor_kernel, logstd_off=LOGSTD_OFF),
        out_shape=jax.ShapeDtypeStruct((bp, HEAD_PAD), jnp.float32),
        grid=(num_tiles,),
        in_specs=[
            pl.BlockSpec((tb, state_dim), lambda i: (i, 0)),              # streamed
            pl.BlockSpec((state_dim, HIDDEN_PAD), lambda i: (0, 0)),      # W1 resident
            pl.BlockSpec((1, HIDDEN_PAD), lambda i: (0, 0)),              # b1
            pl.BlockSpec((HIDDEN_PAD, HIDDEN_PAD), lambda i: (0, 0)),     # W2
            pl.BlockSpec((1, HIDDEN_PAD), lambda i: (0, 0)),              # b2
            pl.BlockSpec((HIDDEN_PAD, HEAD_PAD), lambda i: (0, 0)),       # Wm|Ws fused
            pl.BlockSpec((1, HEAD_PAD), lambda i: (0, 0)),                # bm|bs fused
        ],
        out_specs=pl.BlockSpec((tb, HEAD_PAD), lambda i: (i, 0)),
        compiler_params=pltpu.CompilerParams(
            dimension_semantics=("parallel",),   # 2 TCs on v7x; ~no-op on v5e/v6e
            vmem_limit_bytes=32 * 1024 * 1024,
        ),
    )(
        state_p,
        packed["w1"], packed["b1"],
        packed["w2"], packed["b2"],
        packed["wh"], packed["bh"],
    )

    mean = out[:B, :action_dim]
    log_std = out[:B, LOGSTD_OFF:LOGSTD_OFF + action_dim]
    return mean, log_std
    # TODO(synk): benchmark a truly-narrow two-output variant ((B, action_dim)
    # mean / log_std with masked vst.msk stores) against this 128-lane pack on
    # HBM-bound generations (v6e) and keep whichever wins.


# ---------------------------------------------------------------------------
# Deterministic parameter init (mirrors nn.init.orthogonal_(gain=0.1) + zeros)
# ---------------------------------------------------------------------------
def _orthogonal(key, out_features, in_features, gain=0.1):
    rows, cols = out_features, in_features
    flat = jax.random.normal(key, (max(rows, cols), min(rows, cols)),
                             dtype=jnp.float32)
    q, r = jnp.linalg.qr(flat)
    d = jnp.sign(jnp.diagonal(r))
    q = q * d[None, :]
    if rows < cols:
        q = q.T
    w = gain * q[:rows, :cols]          # PyTorch layout: (out, in)
    return w.T                           # pre-transposed to (in, out) for x @ W


def init_actor_params(key, state_dim, hidden_dim, action_dim):
    k1, k2, k3, k4 = jax.random.split(key, 4)
    return {
        "w1": _orthogonal(k1, hidden_dim, state_dim),
        "b1": jnp.zeros((1, hidden_dim), jnp.float32),
        "w2": _orthogonal(k2, hidden_dim, hidden_dim),
        "b2": jnp.zeros((1, hidden_dim), jnp.float32),
        "wm": _orthogonal(k3, action_dim, hidden_dim),
        "bm": jnp.zeros((1, action_dim), jnp.float32),
        "ws": _orthogonal(k4, action_dim, hidden_dim),
        "bs": jnp.zeros((1, action_dim), jnp.float32),  # log_std bias = 0.0
    }


# ---------------------------------------------------------------------------
# Pure-JAX references: f32 (module semantics) and bf16-matmul (kernel numerics)
# ---------------------------------------------------------------------------
def actor_forward_ref(state, p):
    h1 = jnp.tanh(state @ p["w1"] + p["b1"])
    h2 = jnp.tanh(h1 @ p["w2"] + p["b2"])
    mean = h2 @ p["wm"] + p["bm"]
    log_std = jnp.clip(h2 @ p["ws"] + p["bs"], -1.2, 2.0)
    return mean, log_std


def actor_forward_ref_bf16(state, p):
    bf = jnp.bfloat16
    h1 = jnp.tanh(jnp.dot(state.astype(bf), p["w1"].astype(bf),
                          preferred_element_type=jnp.float32) + p["b1"])
    h2 = jnp.tanh(jnp.dot(h1.astype(bf), p["w2"].astype(bf),
                          preferred_element_type=jnp.float32) + p["b2"])
    mean = jnp.dot(h2.astype(bf), p["wm"].astype(bf),
                   preferred_element_type=jnp.float32) + p["bm"]
    log_std = jnp.clip(
        jnp.dot(h2.astype(bf), p["ws"].astype(bf),
                preferred_element_type=jnp.float32) + p["bs"], -1.2, 2.0)
    return mean, log_std


if __name__ == "__main__":
    B, STATE_DIM, HIDDEN_DIM, ACTION_DIM = 2, 8, 32, 4

    key = jax.random.PRNGKey(0)
    k_state, k_params = jax.random.split(key)

    state = jax.random.normal(k_state, (B, STATE_DIM), dtype=jnp.float32)
    params = init_actor_params(k_params, STATE_DIM, HIDDEN_DIM, ACTION_DIM)
    packed = pack_actor_params(params)

    mean, log_std = actor_forward(state, packed)
    jax.block_until_ready((mean, log_std))
    assert mean.shape == (B, ACTION_DIM) and log_std.shape == (B, ACTION_DIM)

    # Tight check vs. a bf16-matmul reference (same numerics as the kernel).
    mean_bf, log_std_bf = actor_forward_ref_bf16(state, params)
    assert jnp.allclose(mean, mean_bf, atol=1e-3), "mean mismatch (bf16 ref)"
    assert jnp.allclose(log_std, log_std_bf, atol=1e-3), "log_std mismatch (bf16 ref)"

    # Loose check vs. the f32 module semantics (bf16 matmul rounding only).
    mean_ref, log_std_ref = actor_forward_ref(state, params)
    assert jnp.allclose(mean, mean_ref, rtol=5e-2, atol=5e-3), "mean mismatch (f32 ref)"
    assert jnp.allclose(log_std, log_std_ref, rtol=5e-2, atol=5e-3), "log_std mismatch (f32 ref)"
    assert bool(jnp.all(log_std >= -1.2 - 1e-6)) and bool(jnp.all(log_std <= 2.0 + 1e-6))

    # Rollout-sized batch that is not a multiple of the tile: exercises the
    # grid/padding path and the >=2-tile derivation end to end.
    big_state = jax.random.normal(jax.random.PRNGKey(1), (1000, STATE_DIM),
                                  dtype=jnp.float32)
    bm_mean, bm_log_std = actor_forward(big_state, packed)
    jax.block_until_ready((bm_mean, bm_log_std))
    bm_mean_bf, bm_log_std_bf = actor_forward_ref_bf16(big_state, params)
    assert bm_mean.shape == (1000, ACTION_DIM)
    assert jnp.allclose(bm_mean, bm_mean_bf, atol=1e-3), "big mean mismatch"
    assert jnp.allclose(bm_log_std, bm_log_std_bf, atol=1e-3), "big log_std mismatch"

    # NOTE: sample_action (Normal.rsample / tanh squashing / numpy action-bound
    # scaling) is host-side sampling glue around forward(), not kernel work.
    # TODO(synk): at demo-sized B (=2) a plain fused XLA path beats any kernel;
    # the Pallas path is intended for rollout-sized batches.
    print("KERNEL_OK")
</pallas_src>

<mosaic_0001>
module attributes {stable_mosaic.version = 11 : i64} {
  func.func @actor_kernel(%arg0: i32, %arg1: memref<8x8xf32, #tpu.memory_space<vmem>>, %arg2: memref<8x128xbf16, #tpu.memory_space<vmem>>, %arg3: memref<1x128xf32, #tpu.memory_space<vmem>>, %arg4: memref<128x128xbf16, #tpu.memory_space<vmem>>, %arg5: memref<1x128xf32, #tpu.memory_space<vmem>>, %arg6: memref<128x128xbf16, #tpu.memory_space<vmem>>, %arg7: memref<1x128xf32, #tpu.memory_space<vmem>>, %arg8: memref<8x128xf32, #tpu.memory_space<vmem>>) attributes {dimension_semantics = [#tpu.dimension_semantics<parallel>], iteration_bounds = array<i64: 2>, scalar_prefetch = 0 : i64, scratch_operands = 0 : i64, tpu.core_type = #tpu.core_type<tc>, window_params = [{transform_indices = @transform_0, window_bounds = array<i64: 8, 8>}, {pipeline_mode = #tpu.pipeline_mode<synchronous>, transform_indices = @transform_1, window_bounds = array<i64: 8, 128>}, {pipeline_mode = #tpu.pipeline_mode<synchronous>, transform_indices = @transform_2, window_bounds = array<i64: 1, 128>}, {pipeline_mode = #tpu.pipeline_mode<synchronous>, transform_indices = @transform_3, window_bounds = array<i64: 128, 128>}, {pipeline_mode = #tpu.pipeline_mode<synchronous>, transform_indices = @transform_4, window_bounds = array<i64: 1, 128>}, {pipeline_mode = #tpu.pipeline_mode<synchronous>, transform_indices = @transform_5, window_bounds = array<i64: 128, 128>}, {pipeline_mode = #tpu.pipeline_mode<synchronous>, transform_indices = @transform_6, window_bounds = array<i64: 1, 128>}, {transform_indices = @transform_7, window_bounds = array<i64: 8, 128>}]} {
    %c0 = arith.constant 0 : index
    %c0_0 = arith.constant 0 : index
    %0 = vector.load %arg1[%c0, %c0_0] : memref<8x8xf32, #tpu.memory_space<vmem>>, vector<8x8xf32>
    %1 = arith.truncf %0 : vector<8x8xf32> to vector<8x8xbf16>
    %c0_1 = arith.constant 0 : index
    %c0_2 = arith.constant 0 : index
    %2 = vector.load %arg2[%c0_1, %c0_2] : memref<8x128xbf16, #tpu.memory_space<vmem>>, vector<8x128xbf16>
    %cst = arith.constant dense<0.000000e+00> : vector<8x128xf32>
    %3 = tpu.matmul %1, %2, %cst {dimension_numbers = #tpu.dot_dimension_numbers<[1], [0], [0], [1], [0, 0, 1, 1], [], []>} : vector<8x8xbf16>, vector<8x128xbf16>, vector<8x128xf32> -> vector<8x128xf32>
    %c0_3 = arith.constant 0 : index
    %c0_4 = arith.constant 0 : index
    %4 = vector.load %arg3[%c0_3, %c0_4] : memref<1x128xf32, #tpu.memory_space<vmem>>, vector<1x128xf32>
    %5 = vector.broadcast %4 : vector<1x128xf32> to vector<8x128xf32>
    %6 = arith.addf %3, %5 : vector<8x128xf32>
    %7 = math.tanh %6 : vector<8x128xf32>
    %8 = arith.truncf %7 : vector<8x128xf32> to vector<8x128xbf16>
    %c0_5 = arith.constant 0 : index
    %c0_6 = arith.constant 0 : index
    %9 = vector.load %arg4[%c0_5, %c0_6] : memref<128x128xbf16, #tpu.memory_space<vmem>>, vector<128x128xbf16>
    %cst_7 = arith.constant dense<0.000000e+00> : vector<8x128xf32>
    %10 = tpu.matmul %8, %9, %cst_7 {dimension_numbers = #tpu.dot_dimension_numbers<[1], [0], [0], [1], [0, 0, 1, 1], [], []>} : vector<8x128xbf16>, vector<128x128xbf16>, vector<8x128xf32> -> vector<8x128xf32>
    %c0_8 = arith.constant 0 : index
    %c0_9 = arith.constant 0 : index
    %11 = vector.load %arg5[%c0_8, %c0_9] : memref<1x128xf32, #tpu.memory_space<vmem>>, vector<1x128xf32>
    %12 = vector.broadcast %11 : vector<1x128xf32> to vector<8x128xf32>
    %13 = arith.addf %10, %12 : vector<8x128xf32>
    %14 = math.tanh %13 : vector<8x128xf32>
    %15 = arith.truncf %14 : vector<8x128xf32> to vector<8x128xbf16>
    %c0_10 = arith.constant 0 : index
    %c0_11 = arith.constant 0 : index
    %16 = vector.load %arg6[%c0_10, %c0_11] : memref<128x128xbf16, #tpu.memory_space<vmem>>, vector<128x128xbf16>
    %cst_12 = arith.constant dense<0.000000e+00> : vector<8x128xf32>
    %17 = tpu.matmul %15, %16, %cst_12 {dimension_numbers = #tpu.dot_dimension_numbers<[1], [0], [0], [1], [0, 0, 1, 1], [], []>} : vector<8x128xbf16>, vector<128x128xbf16>, vector<8x128xf32> -> vector<8x128xf32>
    %c0_13 = arith.constant 0 : index
    %c0_14 = arith.constant 0 : index
    %18 = vector.load %arg7[%c0_13, %c0_14] : memref<1x128xf32, #tpu.memory_space<vmem>>, vector<1x128xf32>
    %19 = vector.broadcast %18 : vector<1x128xf32> to vector<8x128xf32>
    %20 = arith.addf %17, %19 : vector<8x128xf32>
    %21 = tpu.iota {dimensions = array<i32: 1>} : vector<8x128xi32>
    %c64_i32 = arith.constant 64 : i32
    %22 = vector.broadcast %c64_i32 : i32 to vector<8x128xi32>
    %23 = arith.cmpi sge, %21, %22 : vector<8x128xi32>
    %cst_15 = arith.constant -1.200000e+00 : f32
    %cst_16 = arith.constant 2.000000e+00 : f32
    %24 = vector.broadcast %cst_15 : f32 to vector<8x128xf32>
    %25 = arith.maximumf %24, %20 : vector<8x128xf32>
    %26 = vector.broadcast %cst_16 : f32 to vector<8x128xf32>
    %27 = arith.minimumf %26, %25 : vector<8x128xf32>
    %28 = arith.select %23, %27, %20 : vector<8x128xi1>, vector<8x128xf32>
    %c0_17 = arith.constant 0 : index
    %c0_18 = arith.constant 0 : index
    %29 = vector.load %arg8[%c0_17, %c0_18] : memref<8x128xf32, #tpu.memory_space<vmem>>, vector<8x128xf32>
    tpu.vector_store %arg8[%c0_17, %c0_18], %28 {strides = array<i32>} : memref<8x128xf32, #tpu.memory_space<vmem>>, vector<8x128xf32>,
    return
  }
  func.func @transform_0(%arg0: i32) -> (i32, i32) {
    %c0_i32 = arith.constant 0 : i32
    %c0_i32_0 = arith.constant 0 : i32
    return %arg0, %c0_i32 : i32, i32
  }
  func.func @transform_1(%arg0: i32) -> (i32, i32) {
    %c0_i32 = arith.constant 0 : i32
    %c0_i32_0 = arith.constant 0 : i32
    %c0_i32_1 = arith.constant 0 : i32
    return %c0_i32, %c0_i32_0 : i32, i32
  }
  func.func @transform_2(%arg0: i32) -> (i32, i32) {
    %c0_i32 = arith.constant 0 : i32
    %c0_i32_0 = arith.constant 0 : i32
    %c0_i32_1 = arith.constant 0 : i32
    return %c0_i32, %c0_i32_0 : i32, i32
  }
  func.func @transform_3(%arg0: i32) -> (i32, i32) {
    %c0_i32 = arith.constant 0 : i32
    %c0_i32_0 = arith.constant 0 : i32
    %c0_i32_1 = arith.constant 0 : i32
    return %c0_i32, %c0_i32_0 : i32, i32
  }
  func.func @transform_4(%arg0: i32) -> (i32, i32) {
    %c0_i32 = arith.constant 0 : i32
    %c0_i32_0 = arith.constant 0 : i32
    %c0_i32_1 = arith.constant 0 : i32
    return %c0_i32, %c0_i32_0 : i32, i32
  }
  func.func @transform_5(%arg0: i32) -> (i32, i32) {
    %c0_i32 = arith.constant 0 : i32
    %c0_i32_0 = arith.constant 0 : i32
    %c0_i32_1 = arith.constant 0 : i32
    return %c0_i32, %c0_i32_0 : i32, i32
  }
  func.func @transform_6(%arg0: i32) -> (i32, i32) {
    %c0_i32 = arith.constant 0 : i32
    %c0_i32_0 = arith.constant 0 : i32
    %c0_i32_1 = arith.constant 0 : i32
    return %c0_i32, %c0_i32_0 : i32, i32
  }
  func.func @transform_7(%arg0: i32) -> (i32, i32) {
    %c0_i32 = arith.constant 0 : i32
    %c0_i32_0 = arith.constant 0 : i32
    return %arg0, %c0_i32 : i32, i32
  }
}

</mosaic_0001>

<bundles_post_ra>
// kernel: tpu_custom_call.1
= control target key start
LH: loop header
LB: loop body
LE: loop exit
PB: predicated region body
PF: predicated region fallthrough
CT: control target
= control target key end

     0   :  { %12 = vsyncpa [#allocation3], 0  ;;  %s1213_s0 = inlined_call_operand.vmem [shape: f32[16,8], index: 0, kind: input, shape index: {}]   ;;  %s1214_s1 = inlined_call_operand.vmem [shape: bf16[8,128], index: 1, kind: input, shape index: {}]   ;;  %s1215_s2 = inlined_call_operand.vmem [shape: f32[1,128], index: 2, kind: input, shape index: {}]   ;;  %s1216_s3 = inlined_call_operand.hbm [shape: bf16[128,128], index: 3, kind: input, shape index: {}]   ;;  %s1217_s4 = inlined_call_operand.vmem [shape: f32[1,128], index: 4, kind: input, shape index: {}]   ;;  %s1218_s5 = inlined_call_operand.hbm [shape: bf16[128,128], index: 5, kind: input, shape index: {}]   ;;  %s1219_s6 = inlined_call_operand.vmem [shape: f32[1,128], index: 6, kind: input, shape index: {}]   ;;  %s1220_s7 = inlined_call_operand.hbm [shape: f32[16,128], index: 7, kind: output, shape index: {}]  }
   0x1   :  { %13 = vsyncpa [#allocation6], 0 }
   0x2   :  { %14 = vsyncpa [#allocation4], 0 }
   0x3   :  { %16 = vsyncpa [#allocation4 + $0x1], 0  ;;  %s1044_s24 = smov 0   ;;  %s1046_s25 = smov 0  }
   0x4   :  { %s1048_s26 = smov 0   ;;  %s1050_s27 = smov 0  }
   0x5 LB: > { %s1065_s28 = sadd.s32 4294967295, %s995_s27   ;;  %s691_s29 = sadd.s32 4294967294, %s995_s27   ;;  %s995_s27 = sphi %s1050_s27, %s1234_s27   ;;  %s991_s26 = sphi %s1048_s26, %s1233_s26   ;;  %s987_s25 = sphi %s1046_s25, %s1232_s25   ;;  %s983_s24 = sphi %s1044_s24, %s1231_s24  }
   0x6   : > { %s1069_s30 = sadd.s32 1, %s995_s27   ;;  %s181_s8 = sadd.s32 1, %s991_s26 }
   0x7   : > { %s178_s9 = ssub.s32 %s995_s27, %s1069_s30  ;;  %p191_p0 = scmp.ne.s32.totalorder %s991_s26, %s987_s25 }
   0x8   : > { %p179_p1 = scmp.eq.s32.totalorder %s178_s9, 0  ;;  %p192_p2 = scmp.eq.s32.totalorder %s1065_s28, 1 }
   0x9   : > { %p197_p3 = scmp.ne.s32.totalorder %s987_s25, %s983_s24  ;;  %p198_p4 = scmp.eq.s32.totalorder %s691_s29, 1 }
   0xa   : > { %s1080_s10 = scalar_select %p179_p1, %s991_s26, %s181_s8  }
   0xb   : > { %p1082_p5 = por %p192_p2, %p191_p0  ;;  %p1086_p6 = por %p198_p4, %p197_p3 }
   0xc   : > { %p692_p7 = scmp.ge.s32.totalorder %s995_s27, 1  ;;  %p205_p8 = scmp.lt.s32.totalorder %s995_s27, 3 }
   0xd   : > { %s1223_s12 = scalar_select %p1086_p6, 1, 0 }
   0xe   : > { %p1221_p9 = scmp.eq.s32.totalorder %s1065_s28, 0  ;;  %p1093_p10 = pnand %p692_p7, %p205_p8 }
   0xf   : > { %s997_s14 = smov [#allocation2]   ;;  %s998_s17 = smov [#allocation5]  }
  0x10   : > { %s223_s15 = sshll.u32 %s997_s14, 4  ;;  %p801_p11 = pneg %p1093_p10  ;;  %s224_s15 = int_to_ptr.vmem [resolvable:$true] %s223_s15 }
  0x11   : > { %s239_s18 = sshll.u32 %s998_s17, 4  ;;  %s886_s19 = scalar_lea.vmem %s224_s15, 1024  ;;  %s240_s18 = int_to_ptr.vmem [resolvable:$true] %s239_s18 }
  0x12   : > { %p1101_p12 = pnand %p1221_p9, %p801_p11  ;;  %p887_p0 = scmp.ne.s32.totalorder %s224_s15, %s886_s19 }
  0x13   : > { %p894_p3 = scmp.lt.s32.totalorder %s224_s15, %s224_s15  ;;  %p895_p4 = scmp.lt.s32.totalorder %s886_s19, %s886_s19 }
  0x14   : > { %p877_p13 = pneg %p1101_p12 }
  0x15   : > { %p896_p7 = por %p895_p4, %p894_p3 }
  0x16   : > { %p889_p1 = pnand %p887_p0, %p877_p13 }
  0x18   : > { %p890_p2 = pneg %p889_p1 }
  0x1a   : > { %p897_p8 = pnand %p896_p7, %p890_p2 }
  0x1c   : > { %900 = shalt.err (!%p897_p8)
}
  0x1d   : > { %s999_s20 = smov 64   ;;  %s1000_s21 = smov 4  }
  0x1e   : > { %804 = dma.hbm_to_vmem [thread:$0]  (!%p1101_p12), %s1216_s3, 1024, %s224_s15, [#allocation3], %s999_s20, %s999_s20, %s1000_s21  }
  0x1f   : > { %s912_s29 = scalar_lea.vmem %s240_s18, 1024  ;;  %p920_p9 = scmp.lt.s32.totalorder %s240_s18, %s240_s18 }
  0x20   : > { %p913_p11 = scmp.ne.s32.totalorder %s240_s18, %s912_s29  ;;  %p921_p6 = scmp.lt.s32.totalorder %s912_s29, %s912_s29 }
  0x22   : > { %p915_p0 = pnand %p913_p11, %p877_p13  ;;  %p922_p3 = por %p921_p6, %p920_p9 }
  0x24   : > { %p916_p1 = pneg %p915_p0 }
  0x26   : > { %p923_p2 = pnand %p922_p3, %p916_p1 }
  0x28   : > { %926 = shalt.err (!%p923_p2)
}
  0x29   : > { %807 = dma.hbm_to_vmem [thread:$0]  (!%p1101_p12), %s1218_s5, 1024, %s240_s18, [#allocation6], %s999_s20, %s999_s20, %s1000_s21  }
  0x2a   : > { %265 = sbr.rel (%p1093_p10) target bundleno = 695 (0x2b7), region = 48  ;;  %p1226_p4 = scmp.eq.s32.totalorder (!%p1093_p10), %s1065_s28, 0 }
  0x2f   : > { %970 = dma.done.wait (%p1226_p4), [#allocation3], 1024   ;;  %p1227_p13 = pmov %p1226_p4 }
  0x30   : > { %p1228_p7 = pmov %p1226_p4 }
  0x31   : > { %972 = vsyncadd (%p1227_p13), [#allocation3], 4294966272 }
  0x32   : > { %974 = dma.done.wait (%p1228_p7), [#allocation6], 1024   ;;  %p1229_p6 = pmov %p1226_p4 }
  0x33   : > { %p300_p9 = scmp.lt.s32.totalorder %s1065_s28, 1  ;;  %v1001_v0 = vmov 0.0   ;;  %vm1002_vm0 = vmmov 0   ;;  %vm319_vm1 = vcmask 1043456   ;;  %v307_v1 = vld [vmem:[%s1214_s1] sm:$0xf]  ;;  %v589_v37 = vlaneseq }
  0x34   : > { %976 = vsyncadd (%p1229_p6), [#allocation6], 4294966272  ;;  %745 = vmatprep.subr.bf16.mxu0 %v1001_v0  ;;  %747 = vmatprep.mubr.msk.bf16.mxu0 %vm1002_vm0, %v1001_v0  ;;  %v321_v3 = vsel %vm319_vm1, %v307_v1, 0  ;;  %v855_v5 = vld [vmem:[#allocation2 + $0x38] sm:$0xff]   ;;  %vm315_vm2 = vcmask 64512   ;;  %v856_v6 = vld [vmem:[#allocation2 + $0x30] sm:$0xff]  }
  0x35   : > { %s301_s13 = scalar_select %p300_p9, %s1065_s28, 1  ;;  %751 = vmatprep.subr.bf16.mxu1 %v1001_v0  ;;  %767 = vmatprep.mubr.msk.bf16.mxu1 %vm1002_vm0, %v1001_v0  ;;  %v857_v7 = vld [vmem:[#allocation2 + $0x28] sm:$0xff]   ;;  %v858_v8 = vld [vmem:[#allocation2 + $0x20] sm:$0xff]   ;;  %v859_v9 = vld [vmem:[#allocation2 + $0x18] sm:$0xff]   ;;  %v590_v40 = vand.u32 127, %v589_v37 }
  0x36   : > { %746 = vmatpush3.bf16.msra.mxu0 %v321_v3  ;;  %752 = vmatpush3.bf16.msra.mxu1 %v855_v5  ;;  %v860_v10 = vld [vmem:[#allocation2 + $0x10] sm:$0xff]   ;;  %v861_v11 = vld [vmem:[#allocation2 + $0x8] sm:$0xff]   ;;  %v862_v12 = vld [vmem:[#allocation2] sm:$0xff]   ;;  %s297_s29 = sand.u32 1, %s987_s25  }
  0x37   : > { %s700_s14 = sshll.u32 %s301_s13, 3  ;;  %771 = vmatprep.subr.bf16.mxu0 %v1001_v0  ;;  %753 = vmatprep.subr.bf16.mxu1 %v1001_v0  ;;  %v863_v13 = vld [vmem:[#allocation5 + $0x38] sm:$0xff]   ;;  %v864_v14 = vld [vmem:[#allocation5 + $0x30] sm:$0xff]   ;;  %v865_v15 = vld [vmem:[#allocation5 + $0x28] sm:$0xff]   ;;  %s699_s8 = sshll.u32 %s297_s29, 3  ;;  %vm591_vm3 = vcmp.ge.s32.totalorder %v590_v40, 64 }
  0x38   : > { %s303_s17 = scalar_lea.vmem %s1213_s0, %s700_s14  ;;  %v701_v16 = vld [vmem:[%s1215_s2] ss:$0 sm:$0xff]  ;;  %v867_v25 = vld [vmem:[#allocation5 + $0x18] sm:$0xff]   ;;  %v868_v26 = vld [vmem:[#allocation5 + $0x10] sm:$0xff]   ;;  %s722_s14 = sshll.u32 %s1065_s28, 7 }
  0x39   : > { %v305_v2 = vld [vmem:[%s303_s17] sm:$0xff]  ;;  %v869_v27 = vld [vmem:[#allocation5 + $0x8] sm:$0xff]   ;;  %s299_s15 = scalar_lea.vmem [#allocation7], %s699_s8  ;;  %s1178_s19 = scalar_lea.hbm %s1220_s7, %s722_s14 }
  0x3a   : > { %v306_v4 = vpack.c.bf16 %v305_v2, %v305_v2  ;;  %754 = vmatpush3.bf16.msra.mxu1 %v856_v6  ;;  %v866_v24 = vld [vmem:[#allocation5 + $0x20] sm:$0xff]   ;;  %s610_s16 = sshll.u32 %s299_s15, 4  ;;  %s597_s20 = scalar_lea.sflag [#allocation4], %s297_s29  ;;  %s611_s16 = int_to_ptr.vmem [resolvable:$true] %s610_s16 }
  0x3b   : > { %755 = vmatprep.subr.bf16.mxu1 %v1001_v0  ;;  %v870_v28 = vld [vmem:[#allocation5] sm:$0xff]   ;;  %s927_s21 = scalar_lea.vmem %s611_s16, 128  ;;  %s1003_s28 = smov [#allocation7]  }
  0x3c   : > { %748 = vmatmul.mubr.msk.bf16.vlgmr.msra.gmra.mxu0 %vm315_vm2, %v306_v4  ;;  %v703_v29 = vld [vmem:[%s1217_s4] ss:$0 sm:$0xff]  ;;  %p928_p10 = scmp.ne.s32.totalorder %s611_s16, %s927_s21  ;;  %s931_s22 = sshll.u32 %s1003_s28, 4  ;;  %s932_s22 = int_to_ptr.vmem [resolvable:$false] %s931_s22 }
  0x3d   : > { %787 = vmatprep.mubr.msk.bf16.mxu0 %vm1002_vm0, %v1001_v0  ;;  %772 = vmatpush3.bf16.msra.mxu0 %v863_v13  ;;  %v712_v38 = vld [vmem:[%s1219_s6] ss:$0 sm:$0xff]  ;;  %s933_s23 = scalar_lea.vmem %s932_s22, 256  ;;  %p934_p11 = scmp.lt.s32.totalorder %s611_s16, %s932_s22 }
  0x3e   : > { %756 = vmatpush3.bf16.msra.mxu1 %v857_v7  ;;  %773 = vmatprep.subr.bf16.mxu0 %v1001_v0  ;;  %p929_p12 = pnand %p928_p10, %p1082_p5  ;;  %p935_p0 = scmp.lt.s32.totalorder %s933_s23, %s927_s21 }
  0x3f   : > { %757 = vmatprep.subr.bf16.mxu1 %v1001_v0 }
  0x40   : > { %p930_p8 = pneg %p929_p12  ;;  %p936_p1 = por %p935_p0, %p934_p11 }
  0x41   : > { %774 = vmatpush3.bf16.msra.mxu0 %v864_v14 }
  0x42   : > { %758 = vmatpush3.bf16.msra.mxu1 %v858_v8  ;;  %775 = vmatprep.subr.bf16.mxu0 %v1001_v0  ;;  %p937_p3 = pnand %p936_p1, %p930_p8 }
  0x43   : > { %759 = vmatprep.subr.bf16.mxu1 %v1001_v0 }
  0x45   : > { %776 = vmatpush3.bf16.msra.mxu0 %v865_v15 }
  0x46   : > { %760 = vmatpush3.bf16.msra.mxu1 %v859_v9  ;;  %777 = vmatprep.subr.bf16.mxu0 %v1001_v0 }
  0x47   : > { %761 = vmatprep.subr.bf16.mxu1 %v1001_v0 }
  0x49   : > { %778 = vmatpush3.bf16.msra.mxu0 %v866_v24 }
  0x4a   : > { %762 = vmatpush3.bf16.msra.mxu1 %v860_v10  ;;  %779 = vmatprep.subr.bf16.mxu0 %v1001_v0 }
  0x4b   : > { %763 = vmatprep.subr.bf16.mxu1 %v1001_v0 }
  0x4d   : > { %780 = vmatpush3.bf16.msra.mxu0 %v867_v25 }
  0x4e   : > { %764 = vmatpush3.bf16.msra.mxu1 %v861_v11  ;;  %781 = vmatprep.subr.bf16.mxu0 %v1001_v0 }
  0x4f   : > { %765 = vmatprep.subr.bf16.mxu1 %v1001_v0 }
  0x51   : > { %782 = vmatpush3.bf16.msra.mxu0 %v868_v26 }
  0x52   : > { %766 = vmatpush3.bf16.msra.mxu1 %v862_v12  ;;  %783 = vmatprep.subr.bf16.mxu0 %v1001_v0 }
  0x55   : > { %784 = vmatpush3.bf16.msra.mxu0 %v869_v27 }
  0x56   : > { %785 = vmatprep.subr.bf16.mxu0 %v1001_v0 }
  0x59   : > { %786 = vmatpush3.bf16.msra.mxu0 %v870_v28 }
  0xfc   : > { %v357_v17 = vpop.f32.mrf.mxu0 }
  0xfd   : > { %v358_v18 = vadd.f32 %v701_v16, %v357_v17 }
  0xfe   : > { %v749_v19 = vpop.f32.mrf.mxu0 }
  0xff   : > { %871 = vtanh.f32 %v358_v18 }
 0x100   : > { %v360_v20 = vpop.f32.mrf.mxu0 }
 0x102   : > { %v750_v21 = vpop.f32.mrf.mxu0 }
 0x10c   : > { %v872_v22 = vpop.eup %871 }
 0x10d   : > { %v364_v23 = vpack.c.bf16 %v872_v22, %v872_v22 }
 0x10f   : > { %768 = vmatmul.mubr.bf16.vlgmr.msra.gmra.mxu1 %v364_v23 }
 0x1cf   : > { %v470_v30 = vpop.f32.mrf.mxu1 }
 0x1d0   : > { %v471_v31 = vadd.f32 %v703_v29, %v470_v30 }
 0x1d1   : > { %v769_v32 = vpop.f32.mrf.mxu1 }
 0x1d2   : > { %873 = vtanh.f32 %v471_v31 }
 0x1d3   : > { %v473_v33 = vpop.f32.mrf.mxu1 }
 0x1d5   : > { %v770_v34 = vpop.f32.mrf.mxu1 }
 0x1df   : > { %v874_v35 = vpop.eup %873 }
 0x1e0   : > { %v477_v36 = vpack.c.bf16 %v874_v35, %v874_v35 }
 0x1e2   : > { %788 = vmatmul.mubr.bf16.vlgmr.msra.gmra.mxu0 %v477_v36 }
 0x2a2   : > { %v583_v39 = vpop.f32.mrf.mxu0 }
 0x2a3   : > { %v584_v41 = vadd.f32 %v712_v38, %v583_v39 }
 0x2a4   : > { %v789_v42 = vpop.f32.mrf.mxu0 }
 0x2a5   : > { %v592_v43 = vmax.f32 %v584_v41, -1.2 }
 0x2a6   : > { %v586_v44 = vpop.f32.mrf.mxu0 }
 0x2a7   : > { %v593_v45 = vmin.f32 %v592_v43, 2.0 }
 0x2a8   : > { %v790_v46 = vpop.f32.mrf.mxu0 }
 0x2a9   : > { %v594_v47 = vsel %vm591_vm3, %v593_v45, %v584_v41 }
 0x2aa   : > { %595 = vst [vmem:[%s299_s15] sm:$0xff] %v594_v47 }
 0x2ab   : > { %940 = shalt.err (!%p937_p3)
}
 0x2ac   : > { %s941_s8 = scalar_lea.hbm %s1178_s19, 128  ;;  %s945_s13 = scalar_lea.hbm %s1220_s7, 256 }
 0x2ad   : > { %p942_p2 = scmp.ne.s32.totalorder %s1178_s19, %s941_s8  ;;  %p946_p7 = scmp.lt.s32.totalorder %s1178_s19, %s1220_s7 }
 0x2ae   : > { %p947_p6 = scmp.lt.s32.totalorder %s945_s13, %s941_s8 }
 0x2af   : > { %p943_p4 = pnand %p942_p2, %p1082_p5 }
 0x2b0   : > { %p948_p9 = por %p947_p6, %p946_p7 }
 0x2b1   : > { %p944_p13 = pneg %p943_p4 }
 0x2b3   : > { %p949_p10 = pnand %p948_p9, %p944_p13 }
 0x2b5   : > { %952 = shalt.err (!%p949_p10)
}
 0x2b6   : > { %799 = dma.vmem_to_hbm [thread:$0]  (%p1082_p5), %s611_s16, 128, %s1178_s19, %s597_s20  }
 0x2b7 PF: > { %p816_p12 = scmp.ge.s32.totalorder %s995_s27, 2  ;;  %s622_s17 = sand.u32 1, %s983_s24  }
 0x2b8   : > { %p1230_p8 = scmp.ne.s32.totalorder %s1223_s12, 0  ;;  %s623_s18 = scalar_lea.sflag [#allocation4], %s622_s17 }
 0x2ba   : > { %p809_p11 = pnand %p816_p12, %p1230_p8 }
 0x2bc   : > { %p810_p0 = pneg %p809_p11 }
 0x2be   : > { %978 = dma.done.wait (%p810_p0), %s623_s18, 128  }
 0x2bf   : > { %980 = vsyncadd (%p810_p0), %s623_s18, 4294967168  ;;  %p19_p1 = scmp.ge.s32.totalorder %s1069_s30, 4   ;;  %s1231_s24 = smov %s987_s25 }
 0x2c0   : > { %s1232_s25 = smov %s991_s26  ;;  %s1233_s26 = smov %s1080_s10 }
 0x2c1   : > { %s1234_s27 = smov %s1069_s30  ;;  %21 = sbr.rel (!%p19_p1) target bundleno = 5 (0x5), region = 92 }
 0x2c6   :  { %628 = vsyncpa [#allocation3], 1 }
 0x2c7   :  { %630 = vsyncpa [#allocation3 + $0x1], 1 }
 0x2c8   :  { %631 = vsyncpa [#allocation6], 1 }
 0x2c9   :  { %632 = vsyncpa [#allocation4], 1 }
 0x2ca   :  { %634 = vsyncpa [#allocation4 + $0x1], 1 }

</bundles_post_ra>
